<compile_context>
chip_gen: v7x
topology: tpu7x:2x2x1
jax: 0.10.0
libtpu: 0.0.40
codegen_flags: <defaults>
</compile_context>

<pallas_src>
import jax
import jax.numpy as jnp
from jax.experimental import pallas as pl
from jax.experimental.pallas import tpu as pltpu


def _round_up(n, m):
    return ((n + m - 1) // m) * m


def ffn_kernel(x_ref, w1_ref, b1_ref, w2_ref, b2_ref, o_ref):
    # x_ref: (TM, D) f32   w1_ref: (D, F) bf16   b1_ref: (1, F) f32
    # w2_ref: (F, D) bf16  b2_ref: (1, D) f32    o_ref: (TM, D) f32
    x_f32 = x_ref[...]                       # loaded once, reused (dot + residual)
    x_lo = x_f32.astype(jnp.bfloat16)        # single cast for the MXU

    # fc1 + bias + ReLU  (bf16 MXU operands, f32 accumulation)
    h = jnp.dot(x_lo, w1_ref[...], preferred_element_type=jnp.float32)
    h = jnp.maximum(h + b1_ref[...], 0.0)

    # fc2 + bias
    out = jnp.dot(h.astype(jnp.bfloat16), w2_ref[...],
                  preferred_element_type=jnp.float32)
    out = out + b2_ref[...]

    # residual add in f32 (exact w.r.t. the original x)
    o_ref[...] = (x_f32 + out).astype(o_ref.dtype)


def ffn_pallas(x2d, w1, b1, w2, b2, *, tm=256):
    """x2d: (N, D) f32.  w1: (D, F), b1: (F,), w2: (F, D), b2: (D,)."""
    N, D = x2d.shape
    F_ = w1.shape[1]

    # MXU-aligned row tile; shrink for tiny N so we don't pad 8 -> 256 rows.
    tm_eff = min(tm, _round_up(N, 8))
    N_pad = _round_up(N, tm_eff)
    if N_pad != N:
        x2d = jnp.pad(x2d, ((0, N_pad - N), (0, 0)))

    # bf16 resident weights (halves VMEM + weight DMA); biases stay f32.
    w1_lo = w1.astype(jnp.bfloat16)
    w2_lo = w2.astype(jnp.bfloat16)
    b1_2d = b1.reshape(1, F_).astype(jnp.float32)
    b2_2d = b2.reshape(1, D).astype(jnp.float32)

    # Explicit VMEM budget: resident weights (x2 safety for buffering), double-buffered
    # f32 x/out tiles, the f32 h intermediate plus its bf16 copy, and headroom.
    weight_bytes = (w1_lo.size + w2_lo.size) * 2 + (b1_2d.size + b2_2d.size) * 4
    tile_bytes = 2 * (tm_eff * D * 4) * 2            # x + out tiles, 2 buffers each
    h_bytes = tm_eff * F_ * (4 + 2)
    vmem_limit = int(min(100 * 2**20,
                         max(16 * 2**20,
                             2 * weight_bytes + tile_bytes + h_bytes + 4 * 2**20)))

    grid = (N_pad // tm_eff,)
    y2d = pl.pallas_call(
        ffn_kernel,
        out_shape=jax.ShapeDtypeStruct((N_pad, D), x2d.dtype),
        grid_spec=pltpu.PrefetchScalarGridSpec(
            num_scalar_prefetch=0,
            grid=grid,
            in_specs=[
                pl.BlockSpec((tm_eff, D), lambda i: (i, 0)),   # x row tile
                pl.BlockSpec((D, F_), lambda i: (0, 0)),        # W1 (resident, bf16)
                pl.BlockSpec((1, F_), lambda i: (0, 0)),        # b1
                pl.BlockSpec((F_, D), lambda i: (0, 0)),        # W2 (resident, bf16)
                pl.BlockSpec((1, D), lambda i: (0, 0)),         # b2
            ],
            out_specs=pl.BlockSpec((tm_eff, D), lambda i: (i, 0)),
        ),
        compiler_params=pltpu.CompilerParams(
            dimension_semantics=("parallel",),      # megacore-shardable row axis
            vmem_limit_bytes=vmem_limit,
        ),
    )(x2d, w1_lo, b1_2d, w2_lo, b2_2d)

    return y2d[:N] if N_pad != N else y2d


def ffn_reference(x2d, w1, b1, w2, b2):
    h = jnp.maximum(x2d @ w1 + b1, 0.0)
    out = h @ w2 + b2
    return x2d + out


if __name__ == "__main__":
    # Small shapes consistent with the module's forward: (batch, seq, embed_dims),
    # using the module's default embed_dims=256, feedforward_channels=1024.
    batch, seq = 2, 8
    embed_dims, feedforward_channels = 256, 1024

    key = jax.random.PRNGKey(0)
    kx, k1, kb1, k2, kb2 = jax.random.split(key, 5)

    x = jax.random.normal(kx, (batch, seq, embed_dims), dtype=jnp.float32)

    # Deterministic parameter init (PyTorch Linear weight is (out, in); we store the
    # transposed (in, out) form the kernel consumes).
    lim1 = 1.0 / (embed_dims ** 0.5)
    w1 = jax.random.uniform(k1, (embed_dims, feedforward_channels),
                            minval=-lim1, maxval=lim1, dtype=jnp.float32)
    b1 = jax.random.uniform(kb1, (feedforward_channels,),
                            minval=-lim1, maxval=lim1, dtype=jnp.float32)
    lim2 = 1.0 / (feedforward_channels ** 0.5)
    w2 = jax.random.uniform(k2, (feedforward_channels, embed_dims),
                            minval=-lim2, maxval=lim2, dtype=jnp.float32)
    b2 = jax.random.uniform(kb2, (embed_dims,),
                            minval=-lim2, maxval=lim2, dtype=jnp.float32)

    x2d = x.reshape(batch * seq, embed_dims)
    y2d = ffn_pallas(x2d, w1, b1, w2, b2)
    y = y2d.reshape(batch, seq, embed_dims)
    jax.block_until_ready(y)

    # Correctness vs f32 reference.  Tolerance is loosened because the MXU operands
    # are bf16 (f32 accumulation); residual/bias math stays f32.
    y_ref = ffn_reference(x2d, w1, b1, w2, b2).reshape(batch, seq, embed_dims)
    assert jnp.allclose(y, y_ref, atol=2e-2, rtol=2e-2), "mismatch vs reference"

    print("KERNEL_OK")
</pallas_src>

<mosaic_0001>
module attributes {stable_mosaic.version = 11 : i64} {
  func.func @ffn_kernel(%arg0: i32, %arg1: memref<16x256xf32, #tpu.memory_space<vmem>>, %arg2: memref<256x1024xbf16, #tpu.memory_space<vmem>>, %arg3: memref<1x1024xf32, #tpu.memory_space<vmem>>, %arg4: memref<1024x256xbf16, #tpu.memory_space<vmem>>, %arg5: memref<1x256xf32, #tpu.memory_space<vmem>>, %arg6: memref<16x256xf32, #tpu.memory_space<vmem>>) attributes {dimension_semantics = [#tpu.dimension_semantics<parallel>], iteration_bounds = array<i64: 1>, scalar_prefetch = 0 : i64, scratch_operands = 0 : i64, tpu.core_type = #tpu.core_type<tc>, window_params = [{transform_indices = @transform_0, window_bounds = array<i64: 16, 256>}, {pipeline_mode = #tpu.pipeline_mode<synchronous>, transform_indices = @transform_1, window_bounds = array<i64: 256, 1024>}, {pipeline_mode = #tpu.pipeline_mode<synchronous>, transform_indices = @transform_2, window_bounds = array<i64: 1, 1024>}, {pipeline_mode = #tpu.pipeline_mode<synchronous>, transform_indices = @transform_3, window_bounds = array<i64: 1024, 256>}, {pipeline_mode = #tpu.pipeline_mode<synchronous>, transform_indices = @transform_4, window_bounds = array<i64: 1, 256>}, {transform_indices = @transform_5, window_bounds = array<i64: 16, 256>}]} {
    %c0 = arith.constant 0 : index
    %c0_0 = arith.constant 0 : index
    %0 = vector.load %arg1[%c0, %c0_0] : memref<16x256xf32, #tpu.memory_space<vmem>>, vector<16x256xf32>
    %1 = arith.truncf %0 : vector<16x256xf32> to vector<16x256xbf16>
    %c0_1 = arith.constant 0 : index
    %c0_2 = arith.constant 0 : index
    %2 = vector.load %arg2[%c0_1, %c0_2] : memref<256x1024xbf16, #tpu.memory_space<vmem>>, vector<256x1024xbf16>
    %cst = arith.constant dense<0.000000e+00> : vector<16x1024xf32>
    %3 = tpu.matmul %1, %2, %cst {dimension_numbers = #tpu.dot_dimension_numbers<[1], [0], [0], [1], [0, 0, 1, 1], [], []>} : vector<16x256xbf16>, vector<256x1024xbf16>, vector<16x1024xf32> -> vector<16x1024xf32>
    %c0_3 = arith.constant 0 : index
    %c0_4 = arith.constant 0 : index
    %4 = vector.load %arg3[%c0_3, %c0_4] : memref<1x1024xf32, #tpu.memory_space<vmem>>, vector<1x1024xf32>
    %5 = vector.broadcast %4 : vector<1x1024xf32> to vector<16x1024xf32>
    %6 = arith.addf %3, %5 : vector<16x1024xf32>
    %cst_5 = arith.constant 0.000000e+00 : f32
    %7 = vector.broadcast %cst_5 : f32 to vector<16x1024xf32>
    %8 = arith.maximumf %6, %7 : vector<16x1024xf32>
    %9 = arith.truncf %8 : vector<16x1024xf32> to vector<16x1024xbf16>
    %c0_6 = arith.constant 0 : index
    %c0_7 = arith.constant 0 : index
    %10 = vector.load %arg4[%c0_6, %c0_7] : memref<1024x256xbf16, #tpu.memory_space<vmem>>, vector<1024x256xbf16>
    %cst_8 = arith.constant dense<0.000000e+00> : vector<16x256xf32>
    %11 = tpu.matmul %9, %10, %cst_8 {dimension_numbers = #tpu.dot_dimension_numbers<[1], [0], [0], [1], [0, 0, 1, 1], [], []>} : vector<16x1024xbf16>, vector<1024x256xbf16>, vector<16x256xf32> -> vector<16x256xf32>
    %c0_9 = arith.constant 0 : index
    %c0_10 = arith.constant 0 : index
    %12 = vector.load %arg5[%c0_9, %c0_10] : memref<1x256xf32, #tpu.memory_space<vmem>>, vector<1x256xf32>
    %13 = vector.broadcast %12 : vector<1x256xf32> to vector<16x256xf32>
    %14 = arith.addf %11, %13 : vector<16x256xf32>
    %15 = arith.addf %0, %14 : vector<16x256xf32>
    %c0_11 = arith.constant 0 : index
    %c0_12 = arith.constant 0 : index
    %16 = vector.load %arg6[%c0_11, %c0_12] : memref<16x256xf32, #tpu.memory_space<vmem>>, vector<16x256xf32>
    tpu.vector_store %arg6[%c0_11, %c0_12], %15 {strides = array<i32>} : memref<16x256xf32, #tpu.memory_space<vmem>>, vector<16x256xf32>,
    return
  }
  func.func @transform_0(%arg0: i32) -> (i32, i32) {
    %c0_i32 = arith.constant 0 : i32
    %c0_i32_0 = arith.constant 0 : i32
    return %arg0, %c0_i32 : i32, i32
  }
  func.func @transform_1(%arg0: i32) -> (i32, i32) {
    %c0_i32 = arith.constant 0 : i32
    %c0_i32_0 = arith.constant 0 : i32
    %c0_i32_1 = arith.constant 0 : i32
    return %c0_i32, %c0_i32_0 : i32, i32
  }
  func.func @transform_2(%arg0: i32) -> (i32, i32) {
    %c0_i32 = arith.constant 0 : i32
    %c0_i32_0 = arith.constant 0 : i32
    %c0_i32_1 = arith.constant 0 : i32
    return %c0_i32, %c0_i32_0 : i32, i32
  }
  func.func @transform_3(%arg0: i32) -> (i32, i32) {
    %c0_i32 = arith.constant 0 : i32
    %c0_i32_0 = arith.constant 0 : i32
    %c0_i32_1 = arith.constant 0 : i32
    return %c0_i32, %c0_i32_0 : i32, i32
  }
  func.func @transform_4(%arg0: i32) -> (i32, i32) {
    %c0_i32 = arith.constant 0 : i32
    %c0_i32_0 = arith.constant 0 : i32
    %c0_i32_1 = arith.constant 0 : i32
    return %c0_i32, %c0_i32_0 : i32, i32
  }
  func.func @transform_5(%arg0: i32) -> (i32, i32) {
    %c0_i32 = arith.constant 0 : i32
    %c0_i32_0 = arith.constant 0 : i32
    return %arg0, %c0_i32 : i32, i32
  }
}

</mosaic_0001>

<bundles_post_ra>
// kernel: tpu_custom_call.1
= control target key start
LH: loop header
LB: loop body
LE: loop exit
PB: predicated region body
PF: predicated region fallthrough
CT: control target
= control target key end

     0   :  { %10 = vsyncpa [#allocation3], 0  ;;  %s2819_s0 = inlined_call_operand.hbm [shape: f32[16,256], index: 0, kind: input, shape index: {}]   ;;  %s2820_s1 = inlined_call_operand.hbm [shape: bf16[256,1024], index: 1, kind: input, shape index: {}]   ;;  %s2821_s2 = inlined_call_operand.hbm [shape: f32[1,1024], index: 2, kind: input, shape index: {}]   ;;  %s2822_s3 = inlined_call_operand.hbm [shape: bf16[1024,256], index: 3, kind: input, shape index: {}]   ;;  %s2823_s4 = inlined_call_operand.vmem [shape: f32[1,256], index: 4, kind: input, shape index: {}]   ;;  %s2824_s5 = inlined_call_operand.hbm [shape: f32[16,256], index: 5, kind: output, shape index: {}]  }
   0x1   :  { %11 = vsyncpa [#allocation6], 0 }
   0x2   :  { %12 = vsyncpa [#allocation9], 0 }
   0x3   :  { %13 = vsyncpa [#allocation4], 0  ;;  %s2662_s18 = smov [#allocation5]   ;;  %s2544_s22 = scalar_lea.hbm %s2820_s1, 16384 }
   0x4   :  { %s31_s19 = sshll.u32 %s2662_s18, 4  ;;  %p2545_p0 = scmp.ne.s32.totalorder %s2820_s1, %s2544_s22  ;;  %s32_s19 = int_to_ptr.vmem [resolvable:$true] %s31_s19 }
   0x5   :  { %p2548_p1 = scmp.lt.u32.totalorder %s2544_s22, %s2820_s1 }
   0x7   :  { %p2550_p2 = pnand %p2548_p1, %p2545_p0 }
   0x9   :  { %2553 = shalt.err (!%p2550_p2)
}
   0xa   :  { %s2554_s27 = scalar_lea.vmem %s32_s19, 16384  ;;  %p2559_p4 = scmp.lt.s32.totalorder %s32_s19, %s32_s19 }
   0xb   :  { %p2555_p3 = scmp.ne.s32.totalorder %s32_s19, %s2554_s27  ;;  %p2560_p5 = scmp.lt.s32.totalorder %s2554_s27, %s2554_s27 }
   0xd   :  { %p2561_p6 = por %p2560_p5, %p2559_p4 }
   0xf   :  { %p2562_p7 = pnand %p2561_p6, %p2555_p3 }
  0x11   :  { %2565 = shalt.err (!%p2562_p7)
}
  0x12   :  { %s2663_s28 = smov 512   ;;  %s2664_s29 = smov 32  }
  0x13   :  { %37 = dma.hbm_to_vmem [thread:$0]  %s2820_s1, 16384, %s32_s19, [#allocation6], %s2663_s28, %s2663_s28, %s2664_s29  }
  0x14   :  { %s2665_s7 = smov [#allocation2]   ;;  %s2566_s11 = scalar_lea.hbm %s2819_s0, 512 }
  0x15   :  { %s19_s8 = sshll.u32 %s2665_s7, 4  ;;  %p2567_p8 = scmp.ne.s32.totalorder %s2819_s0, %s2566_s11  ;;  %s20_s8 = int_to_ptr.vmem [resolvable:$true] %s19_s8 }
  0x16   :  { %p2570_p9 = scmp.lt.u32.totalorder %s2566_s11, %s2819_s0 }
  0x18   :  { %p2572_p10 = pnand %p2570_p9, %p2567_p8 }
  0x1a   :  { %2575 = shalt.err (!%p2572_p10)
}
  0x1b   :  { %s2576_s16 = scalar_lea.vmem %s20_s8, 512  ;;  %p2581_p12 = scmp.lt.s32.totalorder %s20_s8, %s20_s8 }
  0x1c   :  { %p2577_p11 = scmp.ne.s32.totalorder %s20_s8, %s2576_s16  ;;  %p2582_p13 = scmp.lt.s32.totalorder %s2576_s16, %s2576_s16 }
  0x1e   :  { %p2583_p0 = por %p2582_p13, %p2581_p12 }
  0x20   :  { %p2584_p1 = pnand %p2583_p0, %p2577_p11 }
  0x22   :  { %2587 = shalt.err (!%p2584_p1)
}
  0x23   :  { %s2666_s1 = smov 256   ;;  %s2667_s17 = smov 16  }
  0x24   :  { %25 = dma.hbm_to_vmem [thread:$0]  %s2819_s0, 512, %s20_s8, [#allocation3], %s2666_s1, %s2666_s1, %s2667_s17  }
  0x25   :  { %s2668_s20 = smov [#allocation7]   ;;  %s2669_s22 = smov [#allocation8]  }
  0x26   :  { %s44_s21 = sshll.u32 %s2668_s20, 4  ;;  %s53_s23 = sshll.u32 %s2669_s22, 4  ;;  %s45_s21 = int_to_ptr.vmem [resolvable:$true] %s44_s21  ;;  %s2730_s23 = int_to_ptr.vmem [resolvable:$true] %s53_s23 }
  0x27   :  { %s2588_s26 = scalar_lea.hbm %s2821_s2, 128 }
  0x28   :  { %p2589_p2 = scmp.ne.s32.totalorder %s2821_s2, %s2588_s26  ;;  %p2592_p3 = scmp.lt.u32.totalorder %s2588_s26, %s2821_s2 }
  0x2a   :  { %p2594_p4 = pnand %p2592_p3, %p2589_p2 }
  0x2c   :  { %2597 = shalt.err (!%p2594_p4)
}
  0x2d   :  { %s2598_s0 = scalar_lea.vmem %s45_s21, 128  ;;  %p2603_p6 = scmp.lt.s32.totalorder %s45_s21, %s45_s21 }
  0x2e   :  { %p2599_p5 = scmp.ne.s32.totalorder %s45_s21, %s2598_s0  ;;  %p2604_p7 = scmp.lt.s32.totalorder %s2598_s0, %s2598_s0 }
  0x30   :  { %p2605_p8 = por %p2604_p7, %p2603_p6 }
  0x32   :  { %p2606_p9 = pnand %p2605_p8, %p2599_p5 }
  0x34   :  { %2609 = shalt.err (!%p2606_p9)
}
  0x35   :  { %47 = dma.hbm_to_vmem [thread:$0]  %s2821_s2, 128, %s45_s21, [#allocation6]  }
  0x36   :  { %s2610_s10 = scalar_lea.hbm %s2822_s3, 16384 }
  0x37   :  { %p2611_p10 = scmp.ne.s32.totalorder %s2822_s3, %s2610_s10  ;;  %p2614_p11 = scmp.lt.u32.totalorder %s2610_s10, %s2822_s3 }
  0x39   :  { %p2616_p12 = pnand %p2614_p11, %p2611_p10 }
  0x3b   :  { %2619 = shalt.err (!%p2616_p12)
}
  0x3c   :  { %s2620_s15 = scalar_lea.vmem %s2730_s23, 16384  ;;  %p2625_p0 = scmp.lt.s32.totalorder %s2730_s23, %s2730_s23 }
  0x3d   :  { %p2621_p13 = scmp.ne.s32.totalorder %s2730_s23, %s2620_s15  ;;  %p2626_p1 = scmp.lt.s32.totalorder %s2620_s15, %s2620_s15 }
  0x3f   :  { %p2627_p2 = por %p2626_p1, %p2625_p0 }
  0x41   :  { %p2628_p3 = pnand %p2627_p2, %p2621_p13 }
  0x43   :  { %2631 = shalt.err (!%p2628_p3)
}
  0x44   :  { %s2670_s2 = smov 128   ;;  %s2671_s16 = smov 8  }
  0x45   :  { %59 = dma.hbm_to_vmem [thread:$0]  %s2822_s3, 16384, %s2730_s23, [#allocation9], %s2670_s2, %s2670_s2, %s2671_s16  }
  0x46   :  { %2654 = dma.done.wait [#allocation3], 512  }
  0x47   :  { %2655 = vsyncadd [#allocation3], 4294966784 }
  0x48   :  { %2656 = dma.done.wait [#allocation6], 16512  }
  0x49   :  { %2657 = vsyncadd [#allocation6], 4294950784 }
  0x4a   :  { %2658 = dma.done.wait [#allocation9], 16384  }
  0x4b   :  { %2659 = vsyncadd [#allocation9], 4294950912  ;;  %v80_v0 = vld [vmem:[#allocation5] sm:$0xff]  ;;  %v75_v17 = vld [vmem:[#allocation2 + $0x8] sm:$0xff]  ;;  %s2672_s21 = smov [#allocation10]  }
  0x4c   :  { %v84_v1 = vld [vmem:[#allocation5 + $0x20] sm:$0xff]  ;;  %v77_v18 = vld [vmem:[#allocation2 + $0x18] sm:$0xff]  ;;  %s2051_s22 = sshll.u32 %s2672_s21, 4  ;;  %s2052_s22 = int_to_ptr.vmem [resolvable:$true] %s2051_s22 }
  0x4d   :  { %v88_v2 = vld [vmem:[#allocation5 + $0x40] sm:$0xff]  ;;  %v2066_v3 = vcombine.high %v80_v0, %v84_v1  ;;  %v2065_v4 = vcombine.low %v80_v0, %v84_v1  ;;  %v2761_v20 = vpack.c.bf16 %v77_v18, %v75_v17  ;;  %v81_v1 = vld [vmem:[#allocation5 + $0x8] sm:$0xff]  ;;  %p2637_p5 = scmp.lt.s32.totalorder %s2052_s22, %s2052_s22 }
  0x4e   :  { %v92_v5 = vld [vmem:[#allocation5 + $0x60] sm:$0xff]  ;;  %v109_v17 = vld [vmem:[#allocation5 + $0xe8] sm:$0xff] }
  0x4f   :  { %v2074_v6 = vcombine.high %v88_v2, %v92_v5  ;;  %v96_v7 = vld [vmem:[#allocation5 + $0x80] sm:$0xff]  ;;  %890 = vmatprep.subr.bf16.mxu1 %v2066_v3  ;;  %v2073_v9 = vcombine.low %v88_v2, %v92_v5  ;;  %922 = vmatprep.mubr.bf16.mxu1 %v2761_v20  ;;  %v85_v2 = vld [vmem:[#allocation5 + $0x28] sm:$0xff]  ;;  %v76_v5 = vld [vmem:[#allocation2 + $0x10] sm:$0xff] }
  0x50   :  { %v100_v8 = vld [vmem:[#allocation5 + $0xa0] sm:$0xff]  ;;  %891 = vmatpush1.bf16.msra.mxu1 %v2065_v4 }
  0x51   :  { %892 = vmatprep.subr.bf16.mxu1 %v2074_v6  ;;  %v2082_v10 = vcombine.high %v96_v7, %v100_v8  ;;  %v104_v11 = vld [vmem:[#allocation5 + $0xc0] sm:$0xff]  ;;  %v2081_v13 = vcombine.low %v96_v7, %v100_v8  ;;  %v89_v7 = vld [vmem:[#allocation5 + $0x48] sm:$0xff] }
  0x52   :  { %v108_v12 = vld [vmem:[#allocation5 + $0xe0] sm:$0xff]  ;;  %v93_v8 = vld [vmem:[#allocation5 + $0x68] sm:$0xff] }
  0x53   :  { %v2090_v14 = vcombine.high %v104_v11, %v108_v12  ;;  %v112_v15 = vld [vmem:[#allocation5 + $0x100] sm:$0xff]  ;;  %v2089_v19 = vcombine.low %v104_v11, %v108_v12  ;;  %v2067_v11 = vcombine.low %v81_v1, %v85_v2  ;;  %v97_v12 = vld [vmem:[#allocation5 + $0x88] sm:$0xff] }
  0x54   :  { %893 = vmatpush1.bf16.msra.mxu1 %v2073_v9  ;;  %v116_v16 = vld [vmem:[#allocation5 + $0x120] sm:$0xff]  ;;  %v2068_v9 = vcombine.high %v81_v1, %v85_v2  ;;  %v185_v2 = vld [vmem:[#allocation5 + $0x348] sm:$0xff] }
  0x55   :  { %894 = vmatprep.subr.bf16.mxu1 %v2082_v10  ;;  %v2098_v21 = vcombine.high %v112_v15, %v116_v16  ;;  %v120_v22 = vld [vmem:[#allocation5 + $0x140] sm:$0xff]  ;;  %v2097_v24 = vcombine.low %v112_v15, %v116_v16  ;;  %v2075_v15 = vcombine.low %v89_v7, %v93_v8  ;;  %v105_v16 = vld [vmem:[#allocation5 + $0xc8] sm:$0xff] }
  0x56   :  { %v124_v23 = vld [vmem:[#allocation5 + $0x160] sm:$0xff] }
  0x57   :  { %v2106_v25 = vcombine.high %v120_v22, %v124_v23  ;;  %v128_v26 = vld [vmem:[#allocation5 + $0x180] sm:$0xff]  ;;  %v2105_v28 = vcombine.low %v120_v22, %v124_v23  ;;  %v117_v22 = vld [vmem:[#allocation5 + $0x128] sm:$0xff]  ;;  %v2092_v23 = vcombine.high %v105_v16, %v109_v17 }
  0x58   :  { %895 = vmatpush1.bf16.msra.mxu1 %v2081_v13  ;;  %v132_v27 = vld [vmem:[#allocation5 + $0x1a0] sm:$0xff]  ;;  %v101_v13 = vld [vmem:[#allocation5 + $0xa8] sm:$0xff] }
  0x59   :  { %896 = vmatprep.subr.bf16.mxu1 %v2090_v14  ;;  %v2114_v29 = vcombine.high %v128_v26, %v132_v27  ;;  %v136_v30 = vld [vmem:[#allocation5 + $0x1c0] sm:$0xff]  ;;  %v2113_v32 = vcombine.low %v128_v26, %v132_v27  ;;  %v2076_v14 = vcombine.high %v89_v7, %v93_v8  ;;  %v2084_v18 = vcombine.high %v97_v12, %v101_v13  ;;  %v125_v27 = vld [vmem:[#allocation5 + $0x168] sm:$0xff] }
  0x5a   :  { %v140_v31 = vld [vmem:[#allocation5 + $0x1e0] sm:$0xff]  ;;  %v193_v8 = vld [vmem:[#allocation5 + $0x388] sm:$0xff] }
  0x5b   :  { %v2122_v33 = vcombine.high %v136_v30, %v140_v31  ;;  %v144_v34 = vld [vmem:[#allocation5 + $0x200] sm:$0xff]  ;;  %v2121_v36 = vcombine.low %v136_v30, %v140_v31  ;;  %v129_v30 = vld [vmem:[#allocation5 + $0x188] sm:$0xff] }
  0x5c   :  { %897 = vmatpush1.bf16.msra.mxu1 %v2089_v19  ;;  %v148_v35 = vld [vmem:[#allocation5 + $0x220] sm:$0xff]  ;;  %v2083_v19 = vcombine.low %v97_v12, %v101_v13  ;;  %v133_v31 = vld [vmem:[#allocation5 + $0x1a8] sm:$0xff] }
  0x5d   :  { %898 = vmatprep.subr.bf16.mxu1 %v2098_v21  ;;  %v152_v37 = vld [vmem:[#allocation5 + $0x240] sm:$0xff]  ;;  %v2130_v39 = vcombine.high %v144_v34, %v148_v35  ;;  %v2129_v40 = vcombine.low %v144_v34, %v148_v35  ;;  %v113_v21 = vld [vmem:[#allocation5 + $0x108] sm:$0xff] }
  0x5e   :  { %v156_v38 = vld [vmem:[#allocation5 + $0x260] sm:$0xff]  ;;  %v2100_v26 = vcombine.high %v113_v21, %v117_v22  ;;  %v137_v34 = vld [vmem:[#allocation5 + $0x1c8] sm:$0xff] }
  0x5f   :  { %v160_v41 = vld [vmem:[#allocation5 + $0x280] sm:$0xff]  ;;  %v2138_v43 = vcombine.high %v152_v37, %v156_v38  ;;  %v2137_v44 = vcombine.low %v152_v37, %v156_v38  ;;  %v141_v35 = vld [vmem:[#allocation5 + $0x1e8] sm:$0xff] }
  0x60   :  { %899 = vmatpush1.bf16.msra.mxu1 %v2097_v24  ;;  %v164_v42 = vld [vmem:[#allocation5 + $0x2a0] sm:$0xff]  ;;  %v2091_v24 = vcombine.low %v105_v16, %v109_v17  ;;  %v2124_v37 = vcombine.high %v137_v34, %v141_v35  ;;  %v145_v38 = vld [vmem:[#allocation5 + $0x208] sm:$0xff] }
  0x61   :  { %900 = vmatprep.subr.bf16.mxu1 %v2106_v25  ;;  %v168_v45 = vld [vmem:[#allocation5 + $0x2c0] sm:$0xff]  ;;  %v2146_v47 = vcombine.high %v160_v41, %v164_v42  ;;  %v2145_v48 = vcombine.low %v160_v41, %v164_v42  ;;  %v121_v25 = vld [vmem:[#allocation5 + $0x148] sm:$0xff] }
  0x62   :  { %v172_v46 = vld [vmem:[#allocation5 + $0x2e0] sm:$0xff]  ;;  %v153_v42 = vld [vmem:[#allocation5 + $0x248] sm:$0xff] }
  0x63   :  { %v176_v49 = vld [vmem:[#allocation5 + $0x300] sm:$0xff]  ;;  %v2154_v51 = vcombine.high %v168_v45, %v172_v46  ;;  %v2153_v52 = vcombine.low %v168_v45, %v172_v46  ;;  %v2350_v46 = vld [vmem:[#allocation8] ss:$8 sps:$4 sm:$0xff]   ;;  %v2366_v17 = vld [vmem:[#allocation8 + $0x64] ss:$8 sps:$4 sm:$0xff]  }
  0x64   :  { %901 = vmatpush1.bf16.msra.mxu1 %v2105_v28  ;;  %v180_v50 = vld [vmem:[#allocation5 + $0x320] sm:$0xff]  ;;  %v2099_v28 = vcombine.low %v113_v21, %v117_v22  ;;  %v205_v16 = vld [vmem:[#allocation5 + $0x3e8] sm:$0xff]  ;;  %v82_v22 = vld [vmem:[#allocation5 + $0x10] sm:$0xff] }
  0x65   :  { %902 = vmatprep.subr.bf16.mxu1 %v2114_v29  ;;  %v184_v53 = vld [vmem:[#allocation5 + $0x340] sm:$0xff]  ;;  %v2162_v55 = vcombine.high %v176_v49, %v180_v50  ;;  %v2161_v56 = vcombine.low %v176_v49, %v180_v50  ;;  %v2108_v29 = vcombine.high %v121_v25, %v125_v27  ;;  %v165_v49 = vld [vmem:[#allocation5 + $0x2a8] sm:$0xff] }
  0x66   :  { %v188_v54 = vld [vmem:[#allocation5 + $0x360] sm:$0xff] }
  0x67   :  { %v192_v57 = vld [vmem:[#allocation5 + $0x380] sm:$0xff]  ;;  %v2170_v59 = vcombine.high %v184_v53, %v188_v54  ;;  %v2169_v60 = vcombine.low %v184_v53, %v188_v54  ;;  %v169_v54 = vld [vmem:[#allocation5 + $0x2c8] sm:$0xff] }
  0x68   :  { %903 = vmatpush1.bf16.msra.mxu1 %v2113_v32  ;;  %v196_v58 = vld [vmem:[#allocation5 + $0x3a0] sm:$0xff]  ;;  %v2107_v32 = vcombine.low %v121_v25, %v125_v27 }
  0x69   :  { %904 = vmatprep.subr.bf16.mxu1 %v2122_v33  ;;  %v200_v61 = vld [vmem:[#allocation5 + $0x3c0] sm:$0xff]  ;;  %v2178_v63 = vcombine.high %v192_v57, %v196_v58  ;;  %v2177_v0 = vcombine.low %v192_v57, %v196_v58  ;;  %v2116_v33 = vcombine.high %v129_v30, %v133_v31  ;;  %v2356_v58 = vld [vmem:[#allocation8 + $0x20] ss:$8 sps:$4 sm:$0xff]  }
  0x6a   :  { %v204_v62 = vld [vmem:[#allocation5 + $0x3e0] sm:$0xff] }
  0x6b   :  { %v2186_v3 = vcombine.high %v200_v61, %v204_v62  ;;  %v74_v4 = vld [vmem:[#allocation2] sm:$0xff]  ;;  %v2185_v6 = vcombine.low %v200_v61, %v204_v62  ;;  %v181_v61 = vld [vmem:[#allocation5 + $0x328] sm:$0xff] }
  0x6c   :  { %905 = vmatpush1.bf16.msra.mxu1 %v2121_v36  ;;  %v2764_v10 = vpack.c.bf16 %v76_v5, %v74_v4  ;;  %v2115_v36 = vcombine.low %v129_v30, %v133_v31  ;;  %v2351_v50 = vld [vmem:[#allocation8 + $0x14] ss:$8 sps:$4 sm:$0xff]   ;;  %v2360_v4 = vld [vmem:[#allocation8 + $0x44] ss:$8 sps:$4 sm:$0xff]   ;;  %v2365_v13 = vld [vmem:[#allocation8 + $0x50] ss:$8 sps:$4 sm:$0xff]  }
  0x6d   :  { %906 = vmatprep.subr.bf16.mxu1 %v2130_v39  ;;  %v149_v39 = vld [vmem:[#allocation5 + $0x228] sm:$0xff]  ;;  %v2357_v62 = vld [vmem:[#allocation8 + $0x34] ss:$8 sps:$4 sm:$0xff]  }
  0x6e   :  { %v2132_v41 = vcombine.high %v145_v38, %v149_v39  ;;  %v2131_v45 = vcombine.low %v145_v38, %v149_v39  ;;  %v2372_v30 = vld [vmem:[#allocation8 + $0x84] ss:$8 sps:$4 sm:$0xff]  }
  0x6f   :  { %v2378_v38 = vld [vmem:[#allocation8 + $0xa4] ss:$8 sps:$4 sm:$0xff]  }
  0x70   :  { %907 = vmatpush1.bf16.msra.mxu1 %v2129_v40  ;;  %v2123_v40 = vcombine.low %v137_v34, %v141_v35  ;;  %v98_v34 = vld [vmem:[#allocation5 + $0x90] sm:$0xff] }
  0x71   :  { %908 = vmatprep.subr.bf16.mxu1 %v2138_v43  ;;  %v157_v43 = vld [vmem:[#allocation5 + $0x268] sm:$0xff]  ;;  %v102_v35 = vld [vmem:[#allocation5 + $0xb0] sm:$0xff] }
  0x74   :  { %909 = vmatpush1.bf16.msra.mxu1 %v2137_v44  ;;  %v2348_v44 = vld [vmem:[#allocation8 + $0x4] ss:$8 sps:$4 sm:$0xff]  }
  0x75   :  { %910 = vmatprep.subr.bf16.mxu1 %v2146_v47  ;;  %v2140_v47 = vcombine.high %v153_v42, %v157_v43  ;;  %1866 = vmatprep.subr.bf16.mxu0 %v2348_v44  ;;  %v2381_v44 = vld [vmem:[#allocation8 + $0xb4] ss:$8 sps:$4 sm:$0xff]  }
  0x76   :  { %1867 = vmatpush1.bf16.msra.mxu0 %v2350_v46 }
  0x77   :  { %1868 = vmatprep.subr.bf16.mxu0 %v2351_v50  ;;  %v2384_v50 = vld [vmem:[#allocation8 + $0xc4] ss:$8 sps:$4 sm:$0xff]  }
  0x78   :  { %911 = vmatpush1.bf16.msra.mxu1 %v2145_v48  ;;  %v161_v48 = vld [vmem:[#allocation5 + $0x288] sm:$0xff] }
  0x79   :  { %912 = vmatprep.subr.bf16.mxu1 %v2154_v51  ;;  %v2139_v51 = vcombine.low %v153_v42, %v157_v43  ;;  %v2148_v53 = vcombine.high %v161_v48, %v165_v49  ;;  %v2147_v57 = vcombine.low %v161_v48, %v165_v49  ;;  %v110_v42 = vld [vmem:[#allocation5 + $0xf0] sm:$0xff]  ;;  %v2383_v49 = vld [vmem:[#allocation8 + $0xb0] ss:$8 sps:$4 sm:$0xff]  }
  0x7a   :  { %v2380_v43 = vld [vmem:[#allocation8 + $0xa0] ss:$8 sps:$4 sm:$0xff]  }
  0x7b   :  { %v118_v48 = vld [vmem:[#allocation5 + $0x130] sm:$0xff] }
  0x7c   :  { %913 = vmatpush1.bf16.msra.mxu1 %v2153_v52  ;;  %v2353_v52 = vld [vmem:[#allocation8 + $0x10] ss:$8 sps:$4 sm:$0xff]  }
  0x7d   :  { %914 = vmatprep.subr.bf16.mxu1 %v2162_v55  ;;  %v173_v55 = vld [vmem:[#allocation5 + $0x2e8] sm:$0xff]  ;;  %1869 = vmatpush1.bf16.msra.mxu0 %v2353_v52 }
  0x80   :  { %915 = vmatpush1.bf16.msra.mxu1 %v2161_v56  ;;  %v2354_v56 = vld [vmem:[#allocation8 + $0x24] ss:$8 sps:$4 sm:$0xff]  }
  0x81   :  { %916 = vmatprep.subr.bf16.mxu1 %v2170_v59  ;;  %v2156_v59 = vcombine.high %v169_v54, %v173_v55  ;;  %1870 = vmatprep.subr.bf16.mxu0 %v2354_v56  ;;  %v2387_v56 = vld [vmem:[#allocation8 + $0xd4] ss:$8 sps:$4 sm:$0xff]  }
  0x82   :  { %1871 = vmatpush1.bf16.msra.mxu0 %v2356_v58 }
  0x83   :  { %1872 = vmatprep.subr.bf16.mxu0 %v2357_v62  ;;  %v2389_v62 = vld [vmem:[#allocation8 + $0xd0] ss:$8 sps:$4 sm:$0xff]  }
  0x84   :  { %917 = vmatpush1.bf16.msra.mxu1 %v2169_v60  ;;  %v177_v60 = vld [vmem:[#allocation5 + $0x308] sm:$0xff] }
  0x85   :  { %918 = vmatprep.subr.bf16.mxu1 %v2178_v63  ;;  %v2155_v63 = vcombine.low %v169_v54, %v173_v55  ;;  %v2164_v1 = vcombine.high %v177_v60, %v181_v61  ;;  %v2163_v5 = vcombine.low %v177_v60, %v181_v61  ;;  %v126_v54 = vld [vmem:[#allocation5 + $0x170] sm:$0xff] }
  0x86   :  { %v2386_v55 = vld [vmem:[#allocation8 + $0xc0] ss:$8 sps:$4 sm:$0xff]  }
  0x87   :  { %v134_v60 = vld [vmem:[#allocation5 + $0x1b0] sm:$0xff] }
  0x88   :  { %919 = vmatpush1.bf16.msra.mxu1 %v2177_v0  ;;  %v2359_v0 = vld [vmem:[#allocation8 + $0x30] ss:$8 sps:$4 sm:$0xff]  }
  0x89   :  { %920 = vmatprep.subr.bf16.mxu1 %v2186_v3  ;;  %v189_v3 = vld [vmem:[#allocation5 + $0x368] sm:$0xff]  ;;  %1873 = vmatpush1.bf16.msra.mxu0 %v2359_v0  ;;  %v138_v0 = vld [vmem:[#allocation5 + $0x1d0] sm:$0xff] }
  0x8a   :  { %v2172_v7 = vcombine.high %v185_v2, %v189_v3  ;;  %1874 = vmatprep.subr.bf16.mxu0 %v2360_v4  ;;  %v2171_v12 = vcombine.low %v185_v2, %v189_v3  ;;  %v2390_v2 = vld [vmem:[#allocation8 + $0xe4] ss:$8 sps:$4 sm:$0xff]   ;;  %v2392_v4 = vld [vmem:[#allocation8 + $0xe0] ss:$8 sps:$4 sm:$0xff]  }
  0x8c   :  { %921 = vmatpush1.bf16.msra.mxu1 %v2185_v6  ;;  %v2362_v6 = vld [vmem:[#allocation8 + $0x40] ss:$8 sps:$4 sm:$0xff]  }
  0x8d   :  { %933 = vmatprep.subr.bf16.mxu1 %v2068_v9  ;;  %v197_v9 = vld [vmem:[#allocation5 + $0x3a8] sm:$0xff]  ;;  %1875 = vmatpush1.bf16.msra.mxu0 %v2362_v6  ;;  %v146_v6 = vld [vmem:[#allocation5 + $0x210] sm:$0xff] }
  0x8f   :  { %923 = vmatmul.mubr.bf16.vlgmr.msra.gmra.mrb[0].mxu1 %v2764_v10 }
  0x90   :  { %934 = vmatpush1.bf16.msra.mxu1 %v2067_v11  ;;  %965 = vmatprep.mubr.bf16.mxu1 %v2761_v20  ;;  %v2363_v11 = vld [vmem:[#allocation8 + $0x54] ss:$8 sps:$4 sm:$0xff]  }
  0x91   :  { %935 = vmatprep.subr.bf16.mxu1 %v2076_v14  ;;  %v2180_v14 = vcombine.high %v193_v8, %v197_v9  ;;  %1876 = vmatprep.subr.bf16.mxu0 %v2363_v11  ;;  %v2395_v11 = vld [vmem:[#allocation8 + $0xf0] ss:$8 sps:$4 sm:$0xff]  }
  0x92   :  { %1877 = vmatpush1.bf16.msra.mxu0 %v2365_v13  ;;  %v154_v13 = vld [vmem:[#allocation5 + $0x250] sm:$0xff] }
  0x93   :  { %1878 = vmatprep.subr.bf16.mxu0 %v2366_v17 }
  0x94   :  { %936 = vmatpush1.bf16.msra.mxu1 %v2075_v15  ;;  %v201_v15 = vld [vmem:[#allocation5 + $0x3c8] sm:$0xff] }
  0x95   :  { %937 = vmatprep.subr.bf16.mxu1 %v2084_v18  ;;  %v2179_v18 = vcombine.low %v193_v8, %v197_v9  ;;  %v2188_v21 = vcombine.high %v201_v15, %v205_v16  ;;  %v2187_v25 = vcombine.low %v201_v15, %v205_v16  ;;  %v2393_v8 = vld [vmem:[#allocation8 + $0xf4] ss:$8 sps:$4 sm:$0xff]   ;;  %v2398_v15 = vld [vmem:[#allocation8 + $0x104] ss:$8 sps:$4 sm:$0xff]  }
  0x98   :  { %938 = vmatpush1.bf16.msra.mxu1 %v2083_v19  ;;  %v2368_v19 = vld [vmem:[#allocation8 + $0x60] ss:$8 sps:$4 sm:$0xff]  }
  0x99   :  { %939 = vmatprep.subr.bf16.mxu1 %v2092_v23  ;;  %v86_v23 = vld [vmem:[#allocation5 + $0x30] sm:$0xff]  ;;  %1879 = vmatpush1.bf16.msra.mxu0 %v2368_v19 }
  0x9a   :  { %v2070_v27 = vcombine.high %v82_v22, %v86_v23  ;;  %v2069_v31 = vcombine.low %v82_v22, %v86_v23  ;;  %v166_v19 = vld [vmem:[#allocation5 + $0x2b0] sm:$0xff] }
  0x9b   :  { %v170_v23 = vld [vmem:[#allocation5 + $0x2d0] sm:$0xff] }
  0x9c   :  { %940 = vmatpush1.bf16.msra.mxu1 %v2091_v24  ;;  %v2369_v24 = vld [vmem:[#allocation8 + $0x74] ss:$8 sps:$4 sm:$0xff]  }
  0x9d   :  { %941 = vmatprep.subr.bf16.mxu1 %v2100_v26  ;;  %v2371_v26 = vld [vmem:[#allocation8 + $0x70] ss:$8 sps:$4 sm:$0xff]   ;;  %1880 = vmatprep.subr.bf16.mxu0 %v2369_v24  ;;  %v174_v24 = vld [vmem:[#allocation5 + $0x2f0] sm:$0xff] }
  0x9e   :  { %1881 = vmatpush1.bf16.msra.mxu0 %v2371_v26  ;;  %v2158_v26 = vcombine.high %v170_v23, %v174_v24 }
  0x9f   :  { %1882 = vmatprep.subr.bf16.mxu0 %v2372_v30 }
  0xa0   :  { %942 = vmatpush1.bf16.msra.mxu1 %v2099_v28  ;;  %v90_v28 = vld [vmem:[#allocation5 + $0x50] sm:$0xff] }
  0xa1   :  { %943 = vmatprep.subr.bf16.mxu1 %v2108_v29  ;;  %v94_v29 = vld [vmem:[#allocation5 + $0x70] sm:$0xff] }
  0xa2   :  { %v2077_v39 = vcombine.low %v90_v28, %v94_v29 }
  0xa4   :  { %944 = vmatpush1.bf16.msra.mxu1 %v2107_v32  ;;  %v2374_v32 = vld [vmem:[#allocation8 + $0x80] ss:$8 sps:$4 sm:$0xff]  }
  0xa5   :  { %945 = vmatprep.subr.bf16.mxu1 %v2116_v33  ;;  %v2078_v33 = vcombine.high %v90_v28, %v94_v29  ;;  %1883 = vmatpush1.bf16.msra.mxu0 %v2374_v32  ;;  %v182_v28 = vld [vmem:[#allocation5 + $0x330] sm:$0xff]  ;;  %v2157_v29 = vcombine.low %v170_v23, %v174_v24  ;;  %v171_v24 = vld [vmem:[#allocation5 + $0x2d8] sm:$0xff] }
  0xa6   :  { %v190_v32 = vld [vmem:[#allocation5 + $0x370] sm:$0xff] }
  0xa8   :  { %946 = vmatpush1.bf16.msra.mxu1 %v2115_v36  ;;  %v2375_v36 = vld [vmem:[#allocation8 + $0x94] ss:$8 sps:$4 sm:$0xff]  }
  0xa9   :  { %947 = vmatprep.subr.bf16.mxu1 %v2124_v37  ;;  %v2377_v37 = vld [vmem:[#allocation8 + $0x90] ss:$8 sps:$4 sm:$0xff]   ;;  %1884 = vmatprep.subr.bf16.mxu0 %v2375_v36  ;;  %v198_v36 = vld [vmem:[#allocation5 + $0x3b0] sm:$0xff] }
  0xaa   :  { %1885 = vmatpush1.bf16.msra.mxu0 %v2377_v37 }
  0xab   :  { %1886 = vmatprep.subr.bf16.mxu0 %v2378_v38 }
  0xac   :  { %948 = vmatpush1.bf16.msra.mxu1 %v2123_v40  ;;  %v2086_v40 = vcombine.high %v98_v34, %v102_v35 }
  0xad   :  { %949 = vmatprep.subr.bf16.mxu1 %v2132_v41  ;;  %v106_v41 = vld [vmem:[#allocation5 + $0xd0] sm:$0xff] }
  0xae   :  { %v2094_v46 = vcombine.high %v106_v41, %v110_v42  ;;  %1887 = vmatpush1.bf16.msra.mxu0 %v2380_v43  ;;  %v83_v43 = vld [vmem:[#allocation5 + $0x18] sm:$0xff] }
  0xaf   :  { %1888 = vmatprep.subr.bf16.mxu0 %v2381_v44  ;;  %v87_v44 = vld [vmem:[#allocation5 + $0x38] sm:$0xff] }
  0xb0   :  { %950 = vmatpush1.bf16.msra.mxu1 %v2131_v45  ;;  %v2085_v45 = vcombine.low %v98_v34, %v102_v35  ;;  %v194_v35 = vld [vmem:[#allocation5 + $0x390] sm:$0xff] }
  0xb1   :  { %951 = vmatprep.subr.bf16.mxu1 %v2140_v47  ;;  %v114_v47 = vld [vmem:[#allocation5 + $0x110] sm:$0xff]  ;;  %v2182_v38 = vcombine.high %v194_v35, %v198_v36 }
  0xb2   :  { %v2102_v52 = vcombine.high %v114_v47, %v118_v48  ;;  %1889 = vmatpush1.bf16.msra.mxu0 %v2383_v49  ;;  %v2071_v49 = vcombine.low %v83_v43, %v87_v44 }
  0xb3   :  { %1890 = vmatprep.subr.bf16.mxu0 %v2384_v50 }
  0xb4   :  { %952 = vmatpush1.bf16.msra.mxu1 %v2139_v51  ;;  %v2093_v51 = vcombine.low %v106_v41, %v110_v42  ;;  %v2181_v41 = vcombine.low %v194_v35, %v198_v36  ;;  %v195_v36 = vld [vmem:[#allocation5 + $0x398] sm:$0xff] }
  0xb5   :  { %953 = vmatprep.subr.bf16.mxu1 %v2148_v53  ;;  %v122_v53 = vld [vmem:[#allocation5 + $0x150] sm:$0xff] }
  0xb6   :  { %v2110_v58 = vcombine.high %v122_v53, %v126_v54  ;;  %1891 = vmatpush1.bf16.msra.mxu0 %v2386_v55  ;;  %v2109_v61 = vcombine.low %v122_v53, %v126_v54  ;;  %v107_v55 = vld [vmem:[#allocation5 + $0xd8] sm:$0xff] }
  0xb7   :  { %1892 = vmatprep.subr.bf16.mxu0 %v2387_v56  ;;  %v111_v56 = vld [vmem:[#allocation5 + $0xf8] sm:$0xff] }
  0xb8   :  { %954 = vmatpush1.bf16.msra.mxu1 %v2147_v57  ;;  %v2101_v57 = vcombine.low %v114_v47, %v118_v48  ;;  %v91_v47 = vld [vmem:[#allocation5 + $0x58] sm:$0xff] }
  0xb9   :  { %955 = vmatprep.subr.bf16.mxu1 %v2156_v59  ;;  %v130_v59 = vld [vmem:[#allocation5 + $0x190] sm:$0xff]  ;;  %v95_v48 = vld [vmem:[#allocation5 + $0x78] sm:$0xff] }
  0xba   :  { %1893 = vmatpush1.bf16.msra.mxu0 %v2389_v62  ;;  %v2117_v3 = vcombine.low %v130_v59, %v134_v60  ;;  %v2080_v50 = vcombine.high %v91_v47, %v95_v48  ;;  %v2079_v53 = vcombine.low %v91_v47, %v95_v48  ;;  %v2776_v48 = vld [vmem:[#allocation7] sm:$0xff] }
  0xbb   :  { %1894 = vmatprep.subr.bf16.mxu0 %v2390_v2  ;;  %v131_v2 = vld [vmem:[#allocation5 + $0x198] sm:$0xff] }
  0xbc   :  { %956 = vmatpush1.bf16.msra.mxu1 %v2155_v63  ;;  %v2118_v63 = vcombine.high %v130_v59, %v134_v60  ;;  %v115_v59 = vld [vmem:[#allocation5 + $0x118] sm:$0xff] }
  0xbd   :  { %957 = vmatprep.subr.bf16.mxu1 %v2164_v1  ;;  %v142_v1 = vld [vmem:[#allocation5 + $0x1f0] sm:$0xff]  ;;  %v119_v60 = vld [vmem:[#allocation5 + $0x138] sm:$0xff] }
  0xbe   :  { %1895 = vmatpush1.bf16.msra.mxu0 %v2392_v4  ;;  %v2125_v9 = vcombine.low %v138_v0, %v142_v1  ;;  %v2104_v62 = vcombine.high %v115_v59, %v119_v60 }
  0xbf   :  { %1896 = vmatprep.subr.bf16.mxu0 %v2393_v8 }
  0xc0   :  { %958 = vmatpush1.bf16.msra.mxu1 %v2163_v5  ;;  %v2126_v5 = vcombine.high %v138_v0, %v142_v1  ;;  %v127_v0 = vld [vmem:[#allocation5 + $0x178] sm:$0xff]  ;;  %v2103_v1 = vcombine.low %v115_v59, %v119_v60 }
  0xc1   :  { %959 = vmatprep.subr.bf16.mxu1 %v2172_v7  ;;  %v150_v7 = vld [vmem:[#allocation5 + $0x230] sm:$0xff] }
  0xc2   :  { %1897 = vmatpush1.bf16.msra.mxu0 %v2395_v11  ;;  %v2133_v16 = vcombine.low %v146_v6, %v150_v7  ;;  %v147_v11 = vld [vmem:[#allocation5 + $0x218] sm:$0xff] }
  0xc3   :  { %1909 = vmatprep.subr.bf16.mxu0 %v2398_v15  ;;  %v155_v15 = vld [vmem:[#allocation5 + $0x258] sm:$0xff] }
  0xc4   :  { %960 = vmatpush1.bf16.msra.mxu1 %v2171_v12  ;;  %v2134_v12 = vcombine.high %v146_v6, %v150_v7  ;;  %v139_v6 = vld [vmem:[#allocation5 + $0x1d8] sm:$0xff] }
  0xc5   :  { %961 = vmatprep.subr.bf16.mxu1 %v2180_v14  ;;  %v158_v14 = vld [vmem:[#allocation5 + $0x270] sm:$0xff]  ;;  %v143_v7 = vld [vmem:[#allocation5 + $0x1f8] sm:$0xff] }
  0xc6   :  { %v2142_v17 = vcombine.high %v154_v13, %v158_v14 }
  0xc8   :  { %962 = vmatpush1.bf16.msra.mxu1 %v2179_v18  ;;  %v162_v18 = vld [vmem:[#allocation5 + $0x290] sm:$0xff] }
  0xc9   :  { %963 = vmatprep.subr.bf16.mxu1 %v2188_v21  ;;  %v2141_v21 = vcombine.low %v154_v13, %v158_v14  ;;  %v2150_v22 = vcombine.high %v162_v18, %v166_v19  ;;  %v2127_v13 = vcombine.low %v139_v6, %v143_v7 }
  0xcc   :  { %964 = vmatpush1.bf16.msra.mxu1 %v2187_v25  ;;  %v2149_v25 = vcombine.low %v162_v18, %v166_v19  ;;  %v163_v19 = vld [vmem:[#allocation5 + $0x298] sm:$0xff] }
  0xcd   :  { %976 = vmatprep.subr.bf16.mxu1 %v2070_v27  ;;  %v178_v27 = vld [vmem:[#allocation5 + $0x310] sm:$0xff] }
  0xce   :  { %v2166_v30 = vcombine.high %v178_v27, %v182_v28 }
  0xcf   :  { %966 = vmatmul.mubr.bf16.vlgmr.msra.gmra.mrb[4].mxu1 %v2764_v10 }
  0xd0   :  { %977 = vmatpush1.bf16.msra.mxu1 %v2069_v31  ;;  %1008 = vmatprep.mubr.bf16.mxu1 %v2761_v20  ;;  %v186_v31 = vld [vmem:[#allocation5 + $0x350] sm:$0xff] }
  0xd1   :  { %978 = vmatprep.subr.bf16.mxu1 %v2078_v33  ;;  %v2165_v33 = vcombine.low %v178_v27, %v182_v28  ;;  %v2174_v34 = vcombine.high %v186_v31, %v190_v32  ;;  %v2173_v37 = vcombine.low %v186_v31, %v190_v32  ;;  %v179_v28 = vld [vmem:[#allocation5 + $0x318] sm:$0xff] }
  0xd2   :  { %v187_v32 = vld [vmem:[#allocation5 + $0x358] sm:$0xff] }
  0xd4   :  { %979 = vmatpush1.bf16.msra.mxu1 %v2077_v39  ;;  %v202_v39 = vld [vmem:[#allocation5 + $0x3d0] sm:$0xff] }
  0xd5   :  { %980 = vmatprep.subr.bf16.mxu1 %v2086_v40  ;;  %v206_v40 = vld [vmem:[#allocation5 + $0x3f0] sm:$0xff] }
  0xd6   :  { %v2190_v42 = vcombine.high %v202_v39, %v206_v40 }
  0xd8   :  { %981 = vmatpush1.bf16.msra.mxu1 %v2085_v45  ;;  %v2189_v45 = vcombine.low %v202_v39, %v206_v40  ;;  %v203_v40 = vld [vmem:[#allocation5 + $0x3d8] sm:$0xff] }
  0xd9   :  { %982 = vmatprep.subr.bf16.mxu1 %v2094_v46  ;;  %v2072_v46 = vcombine.high %v83_v43, %v87_v44 }
  0xdc   :  { %983 = vmatpush1.bf16.msra.mxu1 %v2093_v51  ;;  %v99_v51 = vld [vmem:[#allocation5 + $0x98] sm:$0xff] }
  0xdd   :  { %984 = vmatprep.subr.bf16.mxu1 %v2102_v52  ;;  %v103_v52 = vld [vmem:[#allocation5 + $0xb8] sm:$0xff] }
  0xde   :  { %v2088_v54 = vcombine.high %v99_v51, %v103_v52 }
  0xe0   :  { %985 = vmatpush1.bf16.msra.mxu1 %v2101_v57  ;;  %v2087_v57 = vcombine.low %v99_v51, %v103_v52 }
  0xe1   :  { %986 = vmatprep.subr.bf16.mxu1 %v2110_v58  ;;  %v2096_v58 = vcombine.high %v107_v55, %v111_v56 }
  0xe4   :  { %987 = vmatpush1.bf16.msra.mxu1 %v2109_v61  ;;  %v2095_v61 = vcombine.low %v107_v55, %v111_v56 }
  0xe5   :  { %988 = vmatprep.subr.bf16.mxu1 %v2118_v63  ;;  %v123_v63 = vld [vmem:[#allocation5 + $0x158] sm:$0xff] }
  0xe6   :  { %v2111_v4 = vcombine.low %v123_v63, %v127_v0 }
  0xe8   :  { %989 = vmatpush1.bf16.msra.mxu1 %v2117_v3  ;;  %v135_v3 = vld [vmem:[#allocation5 + $0x1b8] sm:$0xff] }
  0xe9   :  { %990 = vmatprep.subr.bf16.mxu1 %v2126_v5  ;;  %v2120_v5 = vcombine.high %v131_v2, %v135_v3  ;;  %v2119_v8 = vcombine.low %v131_v2, %v135_v3  ;;  %v2399_v2 = vld [vmem:[#allocation8 + $0x110] ss:$8 sps:$4 sm:$0xff]   ;;  %v2404_v3 = vld [vmem:[#allocation8 + $0x124] ss:$8 sps:$4 sm:$0xff]  }
  0xec   :  { %991 = vmatpush1.bf16.msra.mxu1 %v2125_v9  ;;  %v2128_v9 = vcombine.high %v139_v6, %v143_v7  ;;  %v2405_v6 = vld [vmem:[#allocation8 + $0x130] ss:$8 sps:$4 sm:$0xff]   ;;  %v2410_v7 = vld [vmem:[#allocation8 + $0x144] ss:$8 sps:$4 sm:$0xff]  }
  0xed   :  { %992 = vmatprep.subr.bf16.mxu1 %v2134_v12  ;;  %v151_v12 = vld [vmem:[#allocation5 + $0x238] sm:$0xff] }
  0xee   :  { %v2136_v14 = vcombine.high %v147_v11, %v151_v12 }
  0xf0   :  { %993 = vmatpush1.bf16.msra.mxu1 %v2133_v16  ;;  %v159_v16 = vld [vmem:[#allocation5 + $0x278] sm:$0xff] }
  0xf1   :  { %994 = vmatprep.subr.bf16.mxu1 %v2142_v17  ;;  %v2135_v17 = vcombine.low %v147_v11, %v151_v12  ;;  %v2144_v18 = vcombine.high %v155_v15, %v159_v16  ;;  %v2411_v11 = vld [vmem:[#allocation8 + $0x150] ss:$8 sps:$4 sm:$0xff]   ;;  %v2416_v12 = vld [vmem:[#allocation8 + $0x164] ss:$8 sps:$4 sm:$0xff]  }
  0xf4   :  { %995 = vmatpush1.bf16.msra.mxu1 %v2141_v21  ;;  %v167_v21 = vld [vmem:[#allocation5 + $0x2b8] sm:$0xff] }
  0xf5   :  { %996 = vmatprep.subr.bf16.mxu1 %v2150_v22  ;;  %v2143_v22 = vcombine.low %v155_v15, %v159_v16  ;;  %v2152_v23 = vcombine.high %v163_v19, %v167_v21  ;;  %v2417_v15 = vld [vmem:[#allocation8 + $0x170] ss:$8 sps:$4 sm:$0xff]   ;;  %v2422_v16 = vld [vmem:[#allocation8 + $0x184] ss:$8 sps:$4 sm:$0xff]  }
  0xf8   :  { %997 = vmatpush1.bf16.msra.mxu1 %v2149_v25  ;;  %v175_v25 = vld [vmem:[#allocation5 + $0x2f8] sm:$0xff] }
  0xf9   :  { %998 = vmatprep.subr.bf16.mxu1 %v2158_v26  ;;  %v2151_v26 = vcombine.low %v163_v19, %v167_v21  ;;  %v2160_v27 = vcombine.high %v171_v24, %v175_v25  ;;  %v2423_v19 = vld [vmem:[#allocation8 + $0x190] ss:$8 sps:$4 sm:$0xff]   ;;  %v2428_v21 = vld [vmem:[#allocation8 + $0x1a4] ss:$8 sps:$4 sm:$0xff]  }
  0xfc   :  { %999 = vmatpush1.bf16.msra.mxu1 %v2157_v29  ;;  %v183_v29 = vld [vmem:[#allocation5 + $0x338] sm:$0xff] }
  0xfd   :  { %1000 = vmatprep.subr.bf16.mxu1 %v2166_v30  ;;  %v2159_v30 = vcombine.low %v171_v24, %v175_v25  ;;  %v2168_v31 = vcombine.high %v179_v28, %v183_v29  ;;  %v2429_v24 = vld [vmem:[#allocation8 + $0x1b0] ss:$8 sps:$4 sm:$0xff]   ;;  %v2434_v25 = vld [vmem:[#allocation8 + $0x1c4] ss:$8 sps:$4 sm:$0xff]  }
 0x100   :  { %1001 = vmatpush1.bf16.msra.mxu1 %v2165_v33  ;;  %v191_v33 = vld [vmem:[#allocation5 + $0x378] sm:$0xff] }
 0x101   :  { %1002 = vmatprep.subr.bf16.mxu1 %v2174_v34  ;;  %v2167_v34 = vcombine.low %v179_v28, %v183_v29  ;;  %v2176_v35 = vcombine.high %v187_v32, %v191_v33 }
 0x104   :  { %1003 = vmatpush1.bf16.msra.mxu1 %v2173_v37  ;;  %v199_v37 = vld [vmem:[#allocation5 + $0x3b8] sm:$0xff] }
 0x105   :  { %1004 = vmatprep.subr.bf16.mxu1 %v2182_v38  ;;  %v2175_v38 = vcombine.low %v187_v32, %v191_v33  ;;  %v2184_v39 = vcombine.high %v195_v36, %v199_v37  ;;  %v2440_v32 = vld [vmem:[#allocation8 + $0x1e4] ss:$8 sps:$4 sm:$0xff]  }
 0x108   :  { %1005 = vmatpush1.bf16.msra.mxu1 %v2181_v41  ;;  %v207_v41 = vld [vmem:[#allocation5 + $0x3f8] sm:$0xff] }
 0x109   :  { %1006 = vmatprep.subr.bf16.mxu1 %v2190_v42  ;;  %v2183_v42 = vcombine.low %v195_v36, %v199_v37  ;;  %v2192_v43 = vcombine.high %v203_v40, %v207_v41  ;;  %v2191_v44 = vcombine.low %v203_v40, %v207_v41 }
 0x10c   :  { %1007 = vmatpush1.bf16.msra.mxu1 %v2189_v45  ;;  %v210_v45 = vlaneseq }
 0x10d   :  { %1019 = vmatprep.subr.bf16.mxu1 %v2072_v46 }
 0x10e   :  { %v2773_v46 = vshrl.u32 %v210_v45, 7  ;;  %v2441_v45 = vld [vmem:[#allocation8 + $0x1f0] ss:$8 sps:$4 sm:$0xff]  }
 0x10f   :  { %1009 = vmatmul.mubr.bf16.vlgmr.msra.gmra.mrb[8].mxu1 %v2764_v10 }
 0x110   :  { %1020 = vmatpush1.bf16.msra.mxu1 %v2071_v49  ;;  %1051 = vmatprep.mubr.bf16.mxu1 %v2761_v20  ;;  %v2112_v20 = vcombine.high %v123_v63, %v127_v0  ;;  %v212_v47 = vsub.s32 0, %v2773_v46  ;;  %v216_v49 = vsub.s32 1, %v2773_v46  ;;  %v220_v28 = vsub.s32 2, %v2773_v46 }
 0x111   :  { %1021 = vmatprep.subr.bf16.mxu1 %v2080_v50  ;;  %v224_v29 = vsub.s32 3, %v2773_v46 }
 0x112   :  { %v213_v50 = vrot.slane %v2776_v48, %v212_v47  ;;  %v217_v51 = vrot.slane %v2776_v48, %v216_v49 }
 0x113   :  { %v225_v33 = vrot.slane %v2776_v48, %v224_v29 }
 0x114   :  { %1022 = vmatpush1.bf16.msra.mxu1 %v2079_v53 }
 0x115   :  { %1023 = vmatprep.subr.bf16.mxu1 %v2088_v54 }
 0x118   :  { %1024 = vmatpush1.bf16.msra.mxu1 %v2087_v57 }
 0x119   :  { %1025 = vmatprep.subr.bf16.mxu1 %v2096_v58 }
 0x11c   :  { %1026 = vmatpush1.bf16.msra.mxu1 %v2095_v61 }
 0x11d   :  { %1027 = vmatprep.subr.bf16.mxu1 %v2104_v62 }
 0x120   :  { %1028 = vmatpush1.bf16.msra.mxu1 %v2103_v1  ;;  %v2396_v1 = vld [vmem:[#allocation8 + $0x100] ss:$8 sps:$4 sm:$0xff]  }
 0x121   :  { %1029 = vmatprep.subr.bf16.mxu1 %v2112_v20  ;;  %v2401_v20 = vld [vmem:[#allocation8 + $0x114] ss:$8 sps:$4 sm:$0xff]  }
 0x124   :  { %1030 = vmatpush1.bf16.msra.mxu1 %v2111_v4  ;;  %v2402_v4 = vld [vmem:[#allocation8 + $0x120] ss:$8 sps:$4 sm:$0xff]  }
 0x125   :  { %1031 = vmatprep.subr.bf16.mxu1 %v2120_v5  ;;  %v2407_v5 = vld [vmem:[#allocation8 + $0x134] ss:$8 sps:$4 sm:$0xff]  }
 0x128   :  { %1032 = vmatpush1.bf16.msra.mxu1 %v2119_v8  ;;  %v2408_v8 = vld [vmem:[#allocation8 + $0x140] ss:$8 sps:$4 sm:$0xff]  }
 0x129   :  { %1033 = vmatprep.subr.bf16.mxu1 %v2128_v9  ;;  %v2413_v9 = vld [vmem:[#allocation8 + $0x154] ss:$8 sps:$4 sm:$0xff]  }
 0x12c   :  { %1034 = vmatpush1.bf16.msra.mxu1 %v2127_v13  ;;  %v2414_v13 = vld [vmem:[#allocation8 + $0x160] ss:$8 sps:$4 sm:$0xff]  }
 0x12d   :  { %1035 = vmatprep.subr.bf16.mxu1 %v2136_v14  ;;  %v2419_v14 = vld [vmem:[#allocation8 + $0x174] ss:$8 sps:$4 sm:$0xff]  }
 0x130   :  { %1036 = vmatpush1.bf16.msra.mxu1 %v2135_v17  ;;  %v2420_v17 = vld [vmem:[#allocation8 + $0x180] ss:$8 sps:$4 sm:$0xff]  }
 0x131   :  { %1037 = vmatprep.subr.bf16.mxu1 %v2144_v18  ;;  %v2425_v18 = vld [vmem:[#allocation8 + $0x194] ss:$8 sps:$4 sm:$0xff]  }
 0x134   :  { %1038 = vmatpush1.bf16.msra.mxu1 %v2143_v22  ;;  %v2426_v22 = vld [vmem:[#allocation8 + $0x1a0] ss:$8 sps:$4 sm:$0xff]  }
 0x135   :  { %1039 = vmatprep.subr.bf16.mxu1 %v2152_v23  ;;  %v2431_v23 = vld [vmem:[#allocation8 + $0x1b4] ss:$8 sps:$4 sm:$0xff]  }
 0x138   :  { %1040 = vmatpush1.bf16.msra.mxu1 %v2151_v26  ;;  %v2432_v26 = vld [vmem:[#allocation8 + $0x1c0] ss:$8 sps:$4 sm:$0xff]  }
 0x139   :  { %1041 = vmatprep.subr.bf16.mxu1 %v2160_v27  ;;  %v2437_v27 = vld [vmem:[#allocation8 + $0x1d4] ss:$8 sps:$4 sm:$0xff]  }
 0x13c   :  { %1042 = vmatpush1.bf16.msra.mxu1 %v2159_v30  ;;  %v2435_v30 = vld [vmem:[#allocation8 + $0x1d0] ss:$8 sps:$4 sm:$0xff]  }
 0x13d   :  { %1043 = vmatprep.subr.bf16.mxu1 %v2168_v31  ;;  %v221_v31 = vrot.slane %v2776_v48, %v220_v28  ;;  %v2491_v28 = vld [vmem:[#allocation8 + $0x2f4] ss:$8 sps:$4 sm:$0xff]  }
 0x140   :  { %1044 = vmatpush1.bf16.msra.mxu1 %v2167_v34 }
 0x141   :  { %1045 = vmatprep.subr.bf16.mxu1 %v2176_v35  ;;  %v2438_v35 = vld [vmem:[#allocation8 + $0x1e0] ss:$8 sps:$4 sm:$0xff]  }
 0x144   :  { %1046 = vmatpush1.bf16.msra.mxu1 %v2175_v38  ;;  %v2443_v38 = vld [vmem:[#allocation8 + $0x1f4] ss:$8 sps:$4 sm:$0xff]  }
 0x145   :  { %1047 = vmatprep.subr.bf16.mxu1 %v2184_v39 }
 0x148   :  { %1048 = vmatpush1.bf16.msra.mxu1 %v2183_v42 }
 0x149   :  { %1049 = vmatprep.subr.bf16.mxu1 %v2192_v43 }
 0x14c   :  { %1050 = vmatpush1.bf16.msra.mxu1 %v2191_v44 }
 0x14f   :  { %1052 = vmatmul.mubr.bf16.vlgmr.msra.gmra.mrb[12].mxu1 %v2764_v10 }
 0x162   :  { %v924_v52 = vpop.f32.mrb[0].mxu1 }
 0x163   :  { %v925_v53 = vadd.f32 %v924_v52, %v213_v50  ;;  %v926_v10 = vpop.f32.mrb[1].mxu1 }
 0x164   :  { %v927_v54 = vadd.f32 %v926_v10, %v217_v51  ;;  %v928_v55 = vpop.f32.mrb[2].mxu1 }
 0x165   :  { %v1062_v56 = vmax.f32 %v925_v53, 0.0  ;;  %v929_v57 = vadd.f32 %v928_v55, %v213_v50  ;;  %v930_v58 = vpop.f32.mrb[3].mxu1  ;;  %v2444_v55 = vld [vmem:[#allocation8 + $0x200] ss:$8 sps:$4 sm:$0xff]  }
 0x166   :  { %v931_v59 = vadd.f32 %v930_v58, %v217_v51  ;;  %v1063_v61 = vmax.f32 %v927_v54, 0.0  ;;  %v2446_v51 = vld [vmem:[#allocation8 + $0x204] ss:$8 sps:$4 sm:$0xff]  }
 0x167   :  { %v1070_v60 = vmax.f32 %v929_v57, 0.0  ;;  %v2447_v57 = vld [vmem:[#allocation8 + $0x210] ss:$8 sps:$4 sm:$0xff]   ;;  %v2452_v58 = vld [vmem:[#allocation8 + $0x224] ss:$8 sps:$4 sm:$0xff]  }
 0x168   :  { %v1071_v62 = vmax.f32 %v931_v59, 0.0  ;;  %v2450_v59 = vld [vmem:[#allocation8 + $0x220] ss:$8 sps:$4 sm:$0xff]  }
 0x169   :  { %v1078_v63 = vpack.c.bf16 %v1070_v60, %v1062_v56  ;;  %v2449_v56 = vld [vmem:[#allocation8 + $0x214] ss:$8 sps:$4 sm:$0xff]  }
 0x16a   :  { %v1079_v0 = vpack.c.bf16 %v1071_v62, %v1063_v61  ;;  %v2455_v60 = vld [vmem:[#allocation8 + $0x234] ss:$8 sps:$4 sm:$0xff]   ;;  %v2453_v61 = vld [vmem:[#allocation8 + $0x230] ss:$8 sps:$4 sm:$0xff]   ;;  %v2458_v62 = vld [vmem:[#allocation8 + $0x244] ss:$8 sps:$4 sm:$0xff]  }
 0x16c   :  { %1898 = vmatprep.mubr.bf16.mxu0 %v1079_v0  ;;  %v2461_v0 = vld [vmem:[#allocation8 + $0x254] ss:$8 sps:$4 sm:$0xff]  }
 0x16d   :  { %1899 = vmatmul.mubr.bf16.vlgmr.msra.gmra.mrb[0].mxu0 %v1078_v63  ;;  %v2456_v63 = vld [vmem:[#allocation8 + $0x240] ss:$8 sps:$4 sm:$0xff]  }
 0x16e   :  { %1910 = vmatpush1.bf16.msra.mxu0 %v2396_v1  ;;  %v2459_v1 = vld [vmem:[#allocation8 + $0x250] ss:$8 sps:$4 sm:$0xff]  }
 0x16f   :  { %1911 = vmatprep.subr.bf16.mxu0 %v2401_v20  ;;  %v2464_v20 = vld [vmem:[#allocation8 + $0x264] ss:$8 sps:$4 sm:$0xff]  }
 0x172   :  { %1912 = vmatpush1.bf16.msra.mxu0 %v2399_v2  ;;  %v2462_v2 = vld [vmem:[#allocation8 + $0x260] ss:$8 sps:$4 sm:$0xff]  }
 0x173   :  { %1913 = vmatprep.subr.bf16.mxu0 %v2404_v3  ;;  %v2467_v3 = vld [vmem:[#allocation8 + $0x274] ss:$8 sps:$4 sm:$0xff]  }
 0x176   :  { %1914 = vmatpush1.bf16.msra.mxu0 %v2402_v4  ;;  %v2465_v4 = vld [vmem:[#allocation8 + $0x270] ss:$8 sps:$4 sm:$0xff]  }
 0x177   :  { %1915 = vmatprep.subr.bf16.mxu0 %v2407_v5  ;;  %v2470_v5 = vld [vmem:[#allocation8 + $0x284] ss:$8 sps:$4 sm:$0xff]  }
 0x17a   :  { %1916 = vmatpush1.bf16.msra.mxu0 %v2405_v6  ;;  %v2468_v6 = vld [vmem:[#allocation8 + $0x280] ss:$8 sps:$4 sm:$0xff]  }
 0x17b   :  { %1917 = vmatprep.subr.bf16.mxu0 %v2410_v7  ;;  %v2473_v7 = vld [vmem:[#allocation8 + $0x294] ss:$8 sps:$4 sm:$0xff]  }
 0x17e   :  { %1918 = vmatpush1.bf16.msra.mxu0 %v2408_v8  ;;  %v2471_v8 = vld [vmem:[#allocation8 + $0x290] ss:$8 sps:$4 sm:$0xff]  }
 0x17f   :  { %1919 = vmatprep.subr.bf16.mxu0 %v2413_v9  ;;  %v2476_v9 = vld [vmem:[#allocation8 + $0x2a4] ss:$8 sps:$4 sm:$0xff]  }
 0x182   :  { %1920 = vmatpush1.bf16.msra.mxu0 %v2411_v11  ;;  %v2474_v11 = vld [vmem:[#allocation8 + $0x2a0] ss:$8 sps:$4 sm:$0xff]  }
 0x183   :  { %1921 = vmatprep.subr.bf16.mxu0 %v2416_v12  ;;  %v2479_v12 = vld [vmem:[#allocation8 + $0x2b4] ss:$8 sps:$4 sm:$0xff]  }
 0x186   :  { %1922 = vmatpush1.bf16.msra.mxu0 %v2414_v13  ;;  %v2477_v13 = vld [vmem:[#allocation8 + $0x2b0] ss:$8 sps:$4 sm:$0xff]  }
 0x187   :  { %1923 = vmatprep.subr.bf16.mxu0 %v2419_v14  ;;  %v2482_v14 = vld [vmem:[#allocation8 + $0x2c4] ss:$8 sps:$4 sm:$0xff]  }
 0x18a   :  { %1924 = vmatpush1.bf16.msra.mxu0 %v2417_v15  ;;  %v2480_v15 = vld [vmem:[#allocation8 + $0x2c0] ss:$8 sps:$4 sm:$0xff]  }
 0x18b   :  { %1925 = vmatprep.subr.bf16.mxu0 %v2422_v16  ;;  %v2485_v16 = vld [vmem:[#allocation8 + $0x2d4] ss:$8 sps:$4 sm:$0xff]  }
 0x18e   :  { %1926 = vmatpush1.bf16.msra.mxu0 %v2420_v17  ;;  %v228_v17 = vsub.s32 4, %v2773_v46 }
 0x18f   :  { %1927 = vmatprep.subr.bf16.mxu0 %v2425_v18  ;;  %v232_v18 = vsub.s32 5, %v2773_v46 }
 0x192   :  { %1928 = vmatpush1.bf16.msra.mxu0 %v2423_v19  ;;  %v2483_v19 = vld [vmem:[#allocation8 + $0x2d0] ss:$8 sps:$4 sm:$0xff]  }
 0x193   :  { %1929 = vmatprep.subr.bf16.mxu0 %v2428_v21  ;;  %v229_v21 = vrot.slane %v2776_v48, %v228_v17  ;;  %v2539_v17 = vld [vmem:[#allocation8 + $0x3f4] ss:$8 sps:$4 sm:$0xff]  }
 0x196   :  { %1930 = vmatpush1.bf16.msra.mxu0 %v2426_v22  ;;  %v2488_v22 = vld [vmem:[#allocation8 + $0x2e4] ss:$8 sps:$4 sm:$0xff]  }
 0x197   :  { %1931 = vmatprep.subr.bf16.mxu0 %v2431_v23  ;;  %v233_v23 = vrot.slane %v2776_v48, %v232_v18 }
 0x19a   :  { %1932 = vmatpush1.bf16.msra.mxu0 %v2429_v24 }
 0x19b   :  { %1933 = vmatprep.subr.bf16.mxu0 %v2434_v25  ;;  %v2486_v25 = vld [vmem:[#allocation8 + $0x2e0] ss:$8 sps:$4 sm:$0xff]  }
 0x19e   :  { %1934 = vmatpush1.bf16.msra.mxu0 %v2432_v26 }
 0x19f   :  { %1935 = vmatprep.subr.bf16.mxu0 %v2437_v27 }
 0x1a2   :  { %v967_v34 = vpop.f32.mrb[4].mxu1  ;;  %1936 = vmatpush1.bf16.msra.mxu0 %v2435_v30 }
 0x1a3   :  { %v968_v36 = vadd.f32 %v967_v34, %v221_v31  ;;  %v969_v37 = vpop.f32.mrb[5].mxu1  ;;  %1937 = vmatprep.subr.bf16.mxu0 %v2440_v32 }
 0x1a4   :  { %v970_v39 = vadd.f32 %v969_v37, %v225_v33  ;;  %v971_v40 = vpop.f32.mrb[6].mxu1  ;;  %v2494_v37 = vld [vmem:[#allocation8 + $0x304] ss:$8 sps:$4 sm:$0xff]  }
 0x1a5   :  { %v1064_v41 = vmax.f32 %v968_v36, 0.0  ;;  %v972_v42 = vadd.f32 %v971_v40, %v221_v31  ;;  %v973_v43 = vpop.f32.mrb[7].mxu1 }
 0x1a6   :  { %v974_v44 = vadd.f32 %v973_v43, %v225_v33  ;;  %1938 = vmatpush1.bf16.msra.mxu0 %v2438_v35  ;;  %v1065_v52 = vmax.f32 %v970_v39, 0.0  ;;  %v2489_v35 = vld [vmem:[#allocation8 + $0x2f0] ss:$8 sps:$4 sm:$0xff]   ;;  %v2497_v43 = vld [vmem:[#allocation8 + $0x314] ss:$8 sps:$4 sm:$0xff]  }
 0x1a7   :  { %v1072_v50 = vmax.f32 %v972_v42, 0.0  ;;  %1939 = vmatprep.subr.bf16.mxu0 %v2443_v38  ;;  %v2492_v42 = vld [vmem:[#allocation8 + $0x300] ss:$8 sps:$4 sm:$0xff]  }
 0x1a8   :  { %v1073_v53 = vmax.f32 %v974_v44, 0.0  ;;  %v2495_v44 = vld [vmem:[#allocation8 + $0x310] ss:$8 sps:$4 sm:$0xff]  }
 0x1a9   :  { %v1080_v10 = vpack.c.bf16 %v1072_v50, %v1064_v41  ;;  %v2498_v50 = vld [vmem:[#allocation8 + $0x320] ss:$8 sps:$4 sm:$0xff]  }
 0x1aa   :  { %v1081_v54 = vpack.c.bf16 %v1073_v53, %v1065_v52  ;;  %1940 = vmatpush1.bf16.msra.mxu0 %v2441_v45  ;;  %v2500_v45 = vld [vmem:[#allocation8 + $0x324] ss:$8 sps:$4 sm:$0xff]   ;;  %v2501_v52 = vld [vmem:[#allocation8 + $0x330] ss:$8 sps:$4 sm:$0xff]  }
 0x1ab   :  { %1952 = vmatprep.subr.bf16.mxu0 %v2446_v51  ;;  %v2503_v51 = vld [vmem:[#allocation8 + $0x334] ss:$8 sps:$4 sm:$0xff]   ;;  %v2506_v53 = vld [vmem:[#allocation8 + $0x344] ss:$8 sps:$4 sm:$0xff]  }
 0x1ac   :  { %1941 = vmatprep.mubr.bf16.mxu0 %v1081_v54  ;;  %v2509_v54 = vld [vmem:[#allocation8 + $0x354] ss:$8 sps:$4 sm:$0xff]  }
 0x1ad   :  { %1942 = vmatmul.mubr.bf16.vlgmr.msra.gmra.mrb[0].mxu0 %v1080_v10  ;;  %v2504_v10 = vld [vmem:[#allocation8 + $0x340] ss:$8 sps:$4 sm:$0xff]  }
 0x1ae   :  { %1953 = vmatpush1.bf16.msra.mxu0 %v2444_v55  ;;  %v2507_v55 = vld [vmem:[#allocation8 + $0x350] ss:$8 sps:$4 sm:$0xff]  }
 0x1af   :  { %1954 = vmatprep.subr.bf16.mxu0 %v2449_v56  ;;  %v2512_v56 = vld [vmem:[#allocation8 + $0x364] ss:$8 sps:$4 sm:$0xff]  }
 0x1b2   :  { %1955 = vmatpush1.bf16.msra.mxu0 %v2447_v57  ;;  %v2510_v57 = vld [vmem:[#allocation8 + $0x360] ss:$8 sps:$4 sm:$0xff]  }
 0x1b3   :  { %1956 = vmatprep.subr.bf16.mxu0 %v2452_v58  ;;  %v2515_v58 = vld [vmem:[#allocation8 + $0x374] ss:$8 sps:$4 sm:$0xff]  }
 0x1b6   :  { %1957 = vmatpush1.bf16.msra.mxu0 %v2450_v59  ;;  %v2513_v59 = vld [vmem:[#allocation8 + $0x370] ss:$8 sps:$4 sm:$0xff]  }
 0x1b7   :  { %1958 = vmatprep.subr.bf16.mxu0 %v2455_v60  ;;  %v2518_v60 = vld [vmem:[#allocation8 + $0x384] ss:$8 sps:$4 sm:$0xff]  }
 0x1ba   :  { %1959 = vmatpush1.bf16.msra.mxu0 %v2453_v61  ;;  %v2516_v61 = vld [vmem:[#allocation8 + $0x380] ss:$8 sps:$4 sm:$0xff]  }
 0x1bb   :  { %1960 = vmatprep.subr.bf16.mxu0 %v2458_v62  ;;  %v2521_v62 = vld [vmem:[#allocation8 + $0x394] ss:$8 sps:$4 sm:$0xff]  }
 0x1be   :  { %1961 = vmatpush1.bf16.msra.mxu0 %v2456_v63  ;;  %v2519_v63 = vld [vmem:[#allocation8 + $0x390] ss:$8 sps:$4 sm:$0xff]  }
 0x1bf   :  { %1962 = vmatprep.subr.bf16.mxu0 %v2461_v0  ;;  %v2524_v0 = vld [vmem:[#allocation8 + $0x3a4] ss:$8 sps:$4 sm:$0xff]  }
 0x1c2   :  { %1963 = vmatpush1.bf16.msra.mxu0 %v2459_v1  ;;  %v2522_v1 = vld [vmem:[#allocation8 + $0x3a0] ss:$8 sps:$4 sm:$0xff]  }
 0x1c3   :  { %1964 = vmatprep.subr.bf16.mxu0 %v2464_v20  ;;  %v2527_v20 = vld [vmem:[#allocation8 + $0x3b4] ss:$8 sps:$4 sm:$0xff]  }
 0x1c6   :  { %1965 = vmatpush1.bf16.msra.mxu0 %v2462_v2  ;;  %v2525_v2 = vld [vmem:[#allocation8 + $0x3b0] ss:$8 sps:$4 sm:$0xff]  }
 0x1c7   :  { %1966 = vmatprep.subr.bf16.mxu0 %v2467_v3  ;;  %v2530_v3 = vld [vmem:[#allocation8 + $0x3c4] ss:$8 sps:$4 sm:$0xff]  }
 0x1ca   :  { %1967 = vmatpush1.bf16.msra.mxu0 %v2465_v4  ;;  %v2528_v4 = vld [vmem:[#allocation8 + $0x3c0] ss:$8 sps:$4 sm:$0xff]  }
 0x1cb   :  { %1968 = vmatprep.subr.bf16.mxu0 %v2470_v5  ;;  %v2533_v5 = vld [vmem:[#allocation8 + $0x3d4] ss:$8 sps:$4 sm:$0xff]  }
 0x1ce   :  { %1969 = vmatpush1.bf16.msra.mxu0 %v2468_v6  ;;  %v236_v6 = vsub.s32 6, %v2773_v46 }
 0x1cf   :  { %1970 = vmatprep.subr.bf16.mxu0 %v2473_v7  ;;  %v240_v7 = vsub.s32 7, %v2773_v46  ;;  %v2543_v46 = vld [vmem:[#allocation2 + $0x18] sm:$0xff] }
 0x1d2   :  { %1971 = vmatpush1.bf16.msra.mxu0 %v2471_v8  ;;  %v2531_v8 = vld [vmem:[#allocation8 + $0x3d0] ss:$8 sps:$4 sm:$0xff]  }
 0x1d3   :  { %1972 = vmatprep.subr.bf16.mxu0 %v2476_v9  ;;  %v237_v9 = vrot.slane %v2776_v48, %v236_v6 }
 0x1d6   :  { %1973 = vmatpush1.bf16.msra.mxu0 %v2474_v11  ;;  %v2536_v11 = vld [vmem:[#allocation8 + $0x3e4] ss:$8 sps:$4 sm:$0xff]  }
 0x1d7   :  { %1974 = vmatprep.subr.bf16.mxu0 %v2479_v12  ;;  %v241_v12 = vrot.slane %v2776_v48, %v240_v7 }
 0x1da   :  { %1975 = vmatpush1.bf16.msra.mxu0 %v2477_v13 }
 0x1db   :  { %1976 = vmatprep.subr.bf16.mxu0 %v2482_v14  ;;  %v2534_v14 = vld [vmem:[#allocation8 + $0x3e0] ss:$8 sps:$4 sm:$0xff]  }
 0x1de   :  { %1977 = vmatpush1.bf16.msra.mxu0 %v2480_v15 }
 0x1df   :  { %1978 = vmatprep.subr.bf16.mxu0 %v2485_v16 }
 0x1e2   :  { %v1010_v24 = vpop.f32.mrb[8].mxu1  ;;  %1979 = vmatpush1.bf16.msra.mxu0 %v2483_v19 }
 0x1e3   :  { %v1011_v26 = vadd.f32 %v1010_v24, %v229_v21  ;;  %v1012_v27 = vpop.f32.mrb[9].mxu1  ;;  %1980 = vmatprep.subr.bf16.mxu0 %v2488_v22  ;;  %v2537_v24 = vld [vmem:[#allocation8 + $0x3f0] ss:$8 sps:$4 sm:$0xff]  }
 0x1e4   :  { %v1013_v29 = vadd.f32 %v1012_v27, %v233_v23  ;;  %v1014_v30 = vpop.f32.mrb[10].mxu1 }
 0x1e5   :  { %v1066_v31 = vmax.f32 %v1011_v26, 0.0  ;;  %v1015_v32 = vadd.f32 %v1014_v30, %v229_v21  ;;  %v1016_v33 = vpop.f32.mrb[11].mxu1  ;;  %v1214_v30 = vld [vmem:[%s2823_s4] sm:$0x3]  ;;  %s2632_s4 = scalar_lea.vmem %s2052_s22, 512 }
 0x1e6   :  { %v1017_v34 = vadd.f32 %v1016_v33, %v233_v23  ;;  %1981 = vmatpush1.bf16.msra.mxu0 %v2486_v25  ;;  %v1067_v38 = vmax.f32 %v1013_v29, 0.0  ;;  %p2633_p4 = scmp.ne.s32.totalorder %s2052_s22, %s2632_s4  ;;  %p2638_p6 = scmp.lt.s32.totalorder %s2632_s4, %s2632_s4 }
 0x1e7   :  { %v1074_v36 = vmax.f32 %v1015_v32, 0.0  ;;  %1982 = vmatprep.subr.bf16.mxu0 %v2491_v28  ;;  %v1223_v32 = vrot.slane %v1214_v30, %v216_v49 }
 0x1e8   :  { %v1075_v39 = vmax.f32 %v1017_v34, 0.0  ;;  %p2639_p7 = por %p2638_p6, %p2637_p5 }
 0x1e9   :  { %v1082_v40 = vpack.c.bf16 %v1074_v36, %v1066_v31  ;;  %v1219_v31 = vrot.slane %v1214_v30, %v212_v47 }
 0x1ea   :  { %v1083_v41 = vpack.c.bf16 %v1075_v39, %v1067_v38  ;;  %1983 = vmatpush1.bf16.msra.mxu0 %v2489_v35  ;;  %v2540_v38 = vld [vmem:[#allocation2] sm:$0xff]  ;;  %p2640_p8 = pnand %p2639_p7, %p2633_p4 }
 0x1eb   :  { %1995 = vmatprep.subr.bf16.mxu0 %v2494_v37 }
 0x1ec   :  { %1984 = vmatprep.mubr.bf16.mxu0 %v1083_v41 }
 0x1ed   :  { %1985 = vmatmul.mubr.bf16.vlgmr.msra.gmra.mrb[0].mxu0 %v1082_v40 }
 0x1ee   :  { %1996 = vmatpush1.bf16.msra.mxu0 %v2492_v42  ;;  %v2541_v42 = vld [vmem:[#allocation2 + $0x8] sm:$0xff] }
 0x1ef   :  { %1997 = vmatprep.subr.bf16.mxu0 %v2497_v43 }
 0x1f2   :  { %1998 = vmatpush1.bf16.msra.mxu0 %v2495_v44 }
 0x1f3   :  { %1999 = vmatprep.subr.bf16.mxu0 %v2500_v45  ;;  %v2542_v45 = vld [vmem:[#allocation2 + $0x10] sm:$0xff] }
 0x1f6   :  { %2000 = vmatpush1.bf16.msra.mxu0 %v2498_v50 }
 0x1f7   :  { %2001 = vmatprep.subr.bf16.mxu0 %v2503_v51 }
 0x1fa   :  { %2002 = vmatpush1.bf16.msra.mxu0 %v2501_v52 }
 0x1fb   :  { %2003 = vmatprep.subr.bf16.mxu0 %v2506_v53 }
 0x1fe   :  { %2004 = vmatpush1.bf16.msra.mxu0 %v2504_v10 }
 0x1ff   :  { %2005 = vmatprep.subr.bf16.mxu0 %v2509_v54 }
 0x202   :  { %2006 = vmatpush1.bf16.msra.mxu0 %v2507_v55 }
 0x203   :  { %2007 = vmatprep.subr.bf16.mxu0 %v2512_v56 }
 0x206   :  { %2008 = vmatpush1.bf16.msra.mxu0 %v2510_v57 }
 0x207   :  { %2009 = vmatprep.subr.bf16.mxu0 %v2515_v58 }
 0x20a   :  { %2010 = vmatpush1.bf16.msra.mxu0 %v2513_v59 }
 0x20b   :  { %2011 = vmatprep.subr.bf16.mxu0 %v2518_v60 }
 0x20e   :  { %2012 = vmatpush1.bf16.msra.mxu0 %v2516_v61 }
 0x20f   :  { %2013 = vmatprep.subr.bf16.mxu0 %v2521_v62 }
 0x212   :  { %2014 = vmatpush1.bf16.msra.mxu0 %v2519_v63 }
 0x213   :  { %2015 = vmatprep.subr.bf16.mxu0 %v2524_v0 }
 0x216   :  { %2016 = vmatpush1.bf16.msra.mxu0 %v2522_v1 }
 0x217   :  { %2017 = vmatprep.subr.bf16.mxu0 %v2527_v20 }
 0x21a   :  { %2018 = vmatpush1.bf16.msra.mxu0 %v2525_v2 }
 0x21b   :  { %2019 = vmatprep.subr.bf16.mxu0 %v2530_v3 }
 0x21e   :  { %2020 = vmatpush1.bf16.msra.mxu0 %v2528_v4 }
 0x21f   :  { %2021 = vmatprep.subr.bf16.mxu0 %v2533_v5 }
 0x222   :  { %v1053_v13 = vpop.f32.mrb[12].mxu1  ;;  %2022 = vmatpush1.bf16.msra.mxu0 %v2531_v8 }
 0x223   :  { %v1054_v15 = vadd.f32 %v1053_v13, %v237_v9  ;;  %v1055_v16 = vpop.f32.mrb[13].mxu1  ;;  %2023 = vmatprep.subr.bf16.mxu0 %v2536_v11 }
 0x224   :  { %v1056_v18 = vadd.f32 %v1055_v16, %v241_v12  ;;  %v1057_v19 = vpop.f32.mrb[14].mxu1 }
 0x225   :  { %v1058_v21 = vadd.f32 %v1057_v19, %v237_v9  ;;  %v1059_v22 = vpop.f32.mrb[15].mxu1  ;;  %v1068_v25 = vmax.f32 %v1054_v15, 0.0 }
 0x226   :  { %v1060_v23 = vadd.f32 %v1059_v22, %v241_v12  ;;  %2024 = vmatpush1.bf16.msra.mxu0 %v2534_v14  ;;  %v1069_v27 = vmax.f32 %v1056_v18, 0.0 }
 0x227   :  { %v1076_v26 = vmax.f32 %v1058_v21, 0.0  ;;  %2025 = vmatprep.subr.bf16.mxu0 %v2539_v17 }
 0x228   :  { %v1077_v28 = vmax.f32 %v1060_v23, 0.0 }
 0x229   :  { %v1084_v48 = vpack.c.bf16 %v1076_v26, %v1068_v25 }
 0x22a   :  { %v1085_v29 = vpack.c.bf16 %v1077_v28, %v1069_v27  ;;  %2026 = vmatpush1.bf16.msra.mxu0 %v2537_v24 }
 0x22c   :  { %2027 = vmatprep.mubr.bf16.mxu0 %v1085_v29 }
 0x22d   :  { %2028 = vmatmul.mubr.bf16.vlgmr.msra.gmra.mrb[0].mxu0 %v1084_v48 }
 0x300   :  { %v2029_v33 = vpop.f32.mrb[0].mxu0 }
 0x301   :  { %v2321_v34 = vadd.f32 %v2029_v33, %v1219_v31  ;;  %v2031_v35 = vpop.f32.mrb[1].mxu0 }
 0x302   :  { %v2322_v36 = vadd.f32 %v2031_v35, %v1223_v32  ;;  %v2033_v37 = vpop.f32.mrb[2].mxu0 }
 0x303   :  { %v2038_v39 = vadd.f32 %v2540_v38, %v2321_v34  ;;  %v2323_v40 = vadd.f32 %v2033_v37, %v1219_v31  ;;  %v2035_v41 = vpop.f32.mrb[3].mxu0 }
 0x304   :  { %v2039_v43 = vadd.f32 %v2541_v42, %v2322_v36  ;;  %v2324_v44 = vadd.f32 %v2035_v41, %v1223_v32 }
 0x305   :  { %2042 = vst [vmem:[#allocation10] sm:$0xff] %v2038_v39  ;;  %v2040_v47 = vadd.f32 %v2542_v45, %v2323_v40 }
 0x306   :  { %2043 = vst [vmem:[#allocation10 + $0x8] sm:$0xff] %v2039_v43  ;;  %v2041_v49 = vadd.f32 %v2543_v46, %v2324_v44 }
 0x307   :  { %2044 = vst [vmem:[#allocation10 + $0x10] sm:$0xff] %v2040_v47 }
 0x308   :  { %2045 = vst [vmem:[#allocation10 + $0x18] sm:$0xff] %v2041_v49 }
 0x309   :  { %2643 = shalt.err (!%p2640_p8)
}
 0x30a   :  { %s2644_s25 = scalar_lea.hbm %s2824_s5, 512 }
 0x30b   :  { %p2645_p9 = scmp.ne.s32.totalorder %s2824_s5, %s2644_s25  ;;  %p2648_p10 = scmp.lt.u32.totalorder %s2644_s25, %s2824_s5 }
 0x30d   :  { %p2650_p11 = pnand %p2648_p10, %p2645_p9 }
 0x30f   :  { %2653 = shalt.err (!%p2650_p11)
}
 0x310   :  { %2057 = dma.vmem_to_hbm [thread:$0]  %s2052_s22, 512, %s2824_s5, [#allocation4], %s2666_s1, %s2666_s1, %s2667_s17  }
 0x311   :  { %2660 = dma.done.wait [#allocation4], 512  }
 0x312   :  { %2661 = vsyncadd [#allocation4], 4294966784 }
 0x313   :  { %2061 = vsyncpa [#allocation3], 1 }
 0x314   :  { %2062 = vsyncpa [#allocation6], 1 }
 0x315   :  { %2063 = vsyncpa [#allocation9], 1 }
 0x316   :  { %2064 = vsyncpa [#allocation4], 1 }

</bundles_post_ra>
